<compile_context>
chip_gen: v7x
topology: tpu7x:2x2x1
jax: 0.10.0
libtpu: 0.0.40
codegen_flags: <defaults>
</compile_context>

<pallas_src>
import jax
import jax.numpy as jnp
from jax.experimental import pallas as pl
from jax.experimental.pallas import tpu as pltpu


def _round_up(x: int, m: int) -> int:
    return ((x + m - 1) // m) * m


def _vmem_budget() -> tuple[int, int]:
    """Return (tile_budget_bytes, vmem_limit_bytes), generation-aware."""
    cap = 64 * 1024 * 1024  # conservative fallback = v7x-class (64 MiB / core)
    try:
        info = pltpu.get_tpu_info()
        c = int(getattr(info, "vmem_capacity_bytes", 0) or 0)
        if c > 0:
            cap = c
    except Exception:
        pass
    if cap >= 96 * 1024 * 1024:
        # v5e / v6e class: 128 MiB physical VMEM.
        return 64 * 1024 * 1024, 100 * 1024 * 1024
    # v7x class: 64 MiB per TensorCore -> stay well clear of the ceiling.
    return 30 * 1024 * 1024, 48 * 1024 * 1024


def _pick_tiles(M: int, D: int, itemsize: int, budget: int) -> tuple[int, int]:
    """Pick row-tile size tm and in-kernel chunk size tc (tm % tc == 0)."""
    # Sublane packing: 8 rows for 4-byte dtypes, 16 for 2-byte, 32 for 1-byte.
    sub = max(8, 32 // itemsize)
    rows = _round_up(max(M, 1), sub)

    # Chunk so the per-chunk f32 working set stays around <=1 MiB: the f32
    # cast, x*x reduction and x*inv*w for a chunk stay in vregs / small spill
    # instead of a full (tm, D) f32 copy living in VMEM across the reduction.
    tc = max(sub, min(256, (1 << 20) // max(4 * D, 1)))
    tc = max(sub, (tc // sub) * sub)
    tc = min(tc, rows)
    tc = max(sub, (tc // sub) * sub)

    # Per-row VMEM of the pipelined tiles: double-buffered input + output.
    bytes_per_row = 4 * itemsize * D
    # Reserve: resident f32 weight + ~3 f32 copies of one chunk.
    reserve = 4 * D + 3 * tc * 4 * D
    avail = max(budget - reserve, 0)
    tm = avail // max(bytes_per_row, 1)
    tm = min(tm, 2048)
    tm = max(tc, (tm // tc) * tc)

    # Don't make the tile larger than the (rounded) data.
    tm = min(tm, _round_up(M, tc))
    # Prefer >= 2 grid steps so a 2-TensorCore chip (v7x) can shard the
    # "parallel" row axis across both cores; costs at most one extra ~0.35 us
    # pipeline step on single-core chips.
    if M > tc:
        tm = min(tm, max(tc, _round_up((M + 1) // 2, tc)))
    return max(tm, tc), tc


def _rmsnorm_kernel(eps: float, n_chunks: int, tc: int):
    def kernel(x_ref, w_ref, o_ref):
        # Weight is already f32 and resident (constant index_map); broadcast
        # once, hoisted out of the chunk loop (JAX doesn't CSE broadcasts).
        w = jnp.broadcast_to(w_ref[...], (tc, w_ref.shape[-1]))

        def one_chunk(rows):
            x = x_ref[rows, :].astype(jnp.float32)            # x.float()
            ms = jnp.mean(x * x, axis=-1, keepdims=True)       # mean(x^2, -1)
            inv = jax.lax.rsqrt(ms + eps)                      # EUP rsqrt
            o_ref[rows, :] = (x * inv * w).astype(o_ref.dtype)

        if n_chunks == 1:
            one_chunk(slice(None))
        else:
            def body(c, carry):
                r0 = pl.multiple_of(c * tc, tc)
                one_chunk(pl.ds(r0, tc))
                return carry
            jax.lax.fori_loop(0, n_chunks, body, 0, unroll=(n_chunks <= 8))

    return kernel


def rmsnorm_ref(x, weight, eps: float = 1e-6):
    """Pure-JAX reference matching the kernel's contract (output in x.dtype).

    Note: like standard fused RMSNorm kernels, the weight multiply is fused in
    f32 with a single final cast (for f32 inputs this is bit-identical to the
    PyTorch module; for sub-f32 inputs it differs by at most one rounding).
    """
    xf = x.astype(jnp.float32)
    inv = jax.lax.rsqrt(jnp.mean(xf * xf, axis=-1, keepdims=True) + eps)
    return (xf * inv * weight.astype(jnp.float32)).astype(x.dtype)


def rmsnorm(x, weight, eps: float = 1e-6,
            tm: int | None = None, tc: int | None = None):
    """RMSNorm over the last axis of x, scaled by `weight` (shape [D])."""
    orig_shape = x.shape
    D = orig_shape[-1]
    x2d = x.reshape(-1, D)
    M = x2d.shape[0]
    itemsize = jnp.dtype(x.dtype).itemsize

    budget, vmem_limit = _vmem_budget()
    auto_tm, auto_tc = _pick_tiles(M, D, itemsize, budget)
    if tm is None:
        tm = auto_tm
    if tc is None:
        tc = min(auto_tc, tm)
    assert tm % tc == 0, "tm must be a multiple of tc"
    n_chunks = tm // tc

    # Safety valve: if even a minimal tile can't fit the VMEM limit (huge D),
    # fall back to the plain-JAX path instead of failing to compile.
    # TODO(synk): add a D-tiled two-pass Pallas path for very large hidden dims.
    min_bytes = 4 * itemsize * D * tc + 4 * D + 3 * tc * 4 * D
    if min_bytes > int(0.9 * vmem_limit):
        return rmsnorm_ref(x, weight, eps=eps)

    w2d = weight.reshape(1, D).astype(jnp.float32)   # pre-cast once, resident
    grid = (pl.cdiv(M, tm),)

    out = pl.pallas_call(
        _rmsnorm_kernel(eps, n_chunks, tc),
        out_shape=jax.ShapeDtypeStruct((M, D), x.dtype),
        grid_spec=pltpu.PrefetchScalarGridSpec(
            num_scalar_prefetch=0,
            grid=grid,
            in_specs=[
                pl.BlockSpec((tm, D), lambda i: (i, 0)),
                # Constant index_map keeps the weight resident (no re-DMA).
                pl.BlockSpec((1, D), lambda i: (0, 0)),
            ],
            out_specs=pl.BlockSpec((tm, D), lambda i: (i, 0)),
        ),
        compiler_params=pltpu.CompilerParams(
            dimension_semantics=("parallel",),
            vmem_limit_bytes=vmem_limit,
        ),
    )(x2d, w2d)

    return out.reshape(orig_shape)


if __name__ == "__main__":
    key = jax.random.PRNGKey(0)
    kx, kw, kx2, kw2 = jax.random.split(key, 4)

    ok = True

    # Case 1: small f32, single grid step (module-default style shapes).
    B, S, D = 2, 8, 128
    x = jax.random.normal(kx, (B, S, D), dtype=jnp.float32)
    for w in (jnp.ones((D,), jnp.float32),
              1.0 + 0.1 * jax.random.normal(kw, (D,), jnp.float32)):
        out = jax.block_until_ready(rmsnorm(x, w, eps=1e-6))
        ref = rmsnorm_ref(x, w, eps=1e-6)
        ok &= out.shape == x.shape and out.dtype == x.dtype
        ok &= bool(jnp.allclose(out, ref, atol=1e-5, rtol=1e-5))

    # Case 2: bf16 input, multi-step grid with a partial last block and a
    # multi-chunk inner loop (explicit tm/tc).
    B2, S2, D2 = 3, 13, 256          # M = 39 rows
    xb = jax.random.normal(kx2, (B2, S2, D2), dtype=jnp.bfloat16)
    wb = 1.0 + 0.1 * jax.random.normal(kw2, (D2,), dtype=jnp.float32)
    refb = rmsnorm_ref(xb, wb).astype(jnp.float32)
    outb = jax.block_until_ready(rmsnorm(xb, wb, tm=32, tc=16)).astype(jnp.float32)
    ok &= outb.shape == xb.shape
    ok &= bool(jnp.allclose(outb, refb, atol=2e-2, rtol=2e-2))

    # Case 3: same bf16 data through the auto-tiled path (exercises _pick_tiles
    # and the partial-block clipping with the auto tile).
    outb2 = jax.block_until_ready(rmsnorm(xb, wb)).astype(jnp.float32)
    ok &= bool(jnp.allclose(outb2, refb, atol=2e-2, rtol=2e-2))

    assert ok, "mismatch vs reference"
    print("KERNEL_OK")
</pallas_src>

<mosaic_0001>
module attributes {stable_mosaic.version = 11 : i64} {
  func.func @kernel(%arg0: i32, %arg1: memref<16x128xf32, #tpu.memory_space<vmem>>, %arg2: memref<1x128xf32, #tpu.memory_space<vmem>>, %arg3: memref<16x128xf32, #tpu.memory_space<vmem>>) attributes {dimension_semantics = [#tpu.dimension_semantics<parallel>], iteration_bounds = array<i64: 1>, scalar_prefetch = 0 : i64, scratch_operands = 0 : i64, tpu.core_type = #tpu.core_type<tc>, window_params = [{transform_indices = @transform_0, window_bounds = array<i64: 16, 128>}, {pipeline_mode = #tpu.pipeline_mode<synchronous>, transform_indices = @transform_1, window_bounds = array<i64: 1, 128>}, {transform_indices = @transform_2, window_bounds = array<i64: 16, 128>}]} {
    %c0 = arith.constant 0 : index
    %c0_0 = arith.constant 0 : index
    %0 = vector.load %arg2[%c0, %c0_0] : memref<1x128xf32, #tpu.memory_space<vmem>>, vector<1x128xf32>
    %1 = vector.shape_cast %0 : vector<1x128xf32> to vector<1x128xf32>
    %2 = vector.broadcast %1 : vector<1x128xf32> to vector<16x128xf32>
    %c0_1 = arith.constant 0 : index
    %c0_2 = arith.constant 0 : index
    %3 = vector.load %arg1[%c0_1, %c0_2] : memref<16x128xf32, #tpu.memory_space<vmem>>, vector<16x128xf32>
    %4 = arith.mulf %3, %3 : vector<16x128xf32>
    %cst = arith.constant dense<0.000000e+00> : vector<16xf32>
    %5 = vector.multi_reduction <add>, %4, %cst [1] : vector<16x128xf32> to vector<16xf32>
    %6 = vector.shape_cast %5 : vector<16xf32> to vector<16x1xf32>
    %cst_3 = arith.constant 1.280000e+02 : f32
    %7 = vector.broadcast %cst_3 : f32 to vector<16x1xf32>
    %8 = arith.divf %6, %7 : vector<16x1xf32>
    %cst_4 = arith.constant 9.99999997E-7 : f32
    %9 = vector.broadcast %cst_4 : f32 to vector<16x1xf32>
    %10 = arith.addf %8, %9 : vector<16x1xf32>
    %11 = math.rsqrt %10 : vector<16x1xf32>
    %12 = vector.broadcast %11 : vector<16x1xf32> to vector<16x128xf32>
    %13 = arith.mulf %3, %12 : vector<16x128xf32>
    %14 = arith.mulf %13, %2 : vector<16x128xf32>
    %c0_5 = arith.constant 0 : index
    %c0_6 = arith.constant 0 : index
    %15 = vector.load %arg3[%c0_5, %c0_6] : memref<16x128xf32, #tpu.memory_space<vmem>>, vector<16x128xf32>
    tpu.vector_store %arg3[%c0_5, %c0_6], %14 {strides = array<i32>} : memref<16x128xf32, #tpu.memory_space<vmem>>, vector<16x128xf32>,
    return
  }
  func.func @transform_0(%arg0: i32) -> (i32, i32) {
    %c0_i32 = arith.constant 0 : i32
    %c0_i32_0 = arith.constant 0 : i32
    return %arg0, %c0_i32 : i32, i32
  }
  func.func @transform_1(%arg0: i32) -> (i32, i32) {
    %c0_i32 = arith.constant 0 : i32
    %c0_i32_0 = arith.constant 0 : i32
    %c0_i32_1 = arith.constant 0 : i32
    return %c0_i32, %c0_i32_0 : i32, i32
  }
  func.func @transform_2(%arg0: i32) -> (i32, i32) {
    %c0_i32 = arith.constant 0 : i32
    %c0_i32_0 = arith.constant 0 : i32
    return %arg0, %c0_i32 : i32, i32
  }
}

</mosaic_0001>

<bundles_post_ra>
// kernel: tpu_custom_call.1
= control target key start
LH: loop header
LB: loop body
LE: loop exit
PB: predicated region body
PF: predicated region fallthrough
CT: control target
= control target key end

     0   :  { %7 = vsyncpa [#allocation3], 0  ;;  %s180_s0 = inlined_call_operand.hbm [shape: f32[16,128], index: 0, kind: input, shape index: {}]   ;;  %s181_s1 = inlined_call_operand.vmem [shape: f32[1,128], index: 1, kind: input, shape index: {}]   ;;  %s182_s2 = inlined_call_operand.hbm [shape: f32[16,128], index: 2, kind: output, shape index: {}]  }
   0x1   :  { %8 = vsyncpa [#allocation4], 0  ;;  %s128_s9 = smov [#allocation2]   ;;  %s80_s13 = scalar_lea.hbm %s180_s0, 256 }
   0x2   :  { %s14_s10 = sshll.u32 %s128_s9, 4  ;;  %p81_p0 = scmp.ne.s32.totalorder %s180_s0, %s80_s13  ;;  %s15_s10 = int_to_ptr.vmem [resolvable:$true] %s14_s10 }
   0x3   :  { %p84_p1 = scmp.lt.u32.totalorder %s80_s13, %s180_s0 }
   0x5   :  { %p86_p2 = pnand %p84_p1, %p81_p0 }
   0x7   :  { %89 = shalt.err (!%p86_p2)
}
   0x8   :  { %s90_s18 = scalar_lea.vmem %s15_s10, 256  ;;  %p95_p4 = scmp.lt.s32.totalorder %s15_s10, %s15_s10 }
   0x9   :  { %p91_p3 = scmp.ne.s32.totalorder %s15_s10, %s90_s18  ;;  %p96_p5 = scmp.lt.s32.totalorder %s90_s18, %s90_s18 }
   0xb   :  { %p97_p6 = por %p96_p5, %p95_p4 }
   0xd   :  { %p98_p7 = pnand %p97_p6, %p91_p3 }
   0xf   :  { %101 = shalt.err (!%p98_p7)
}
  0x10   :  { %s129_s19 = smov 128   ;;  %s130_s20 = smov 8  }
  0x11   :  { %20 = dma.hbm_to_vmem [thread:$0]  %s180_s0, 256, %s15_s10, [#allocation3], %s129_s19, %s129_s19, %s130_s20  }
  0x12   :  { %124 = dma.done.wait [#allocation3], 256  }
  0x13   :  { %125 = vsyncadd [#allocation3], 4294967040  ;;  %v33_v0 = vld [vmem:[#allocation2] sm:$0xff]  ;;  %v34_v1 = vld [vmem:[#allocation2 + $0x8] sm:$0xff]  ;;  %s131_s0 = smov [#allocation5]  }
  0x14   :  { %v35_v2 = vmul.f32 %v33_v0, %v33_v0  ;;  %v36_v3 = vmul.f32 %v34_v1, %v34_v1  ;;  %v71_v11 = vld [vmem:[%s181_s1] ss:$0 sm:$0xff]  ;;  %s59_s25 = sshll.u32 %s131_s0, 4  ;;  %s60_s25 = int_to_ptr.vmem [resolvable:$true] %s59_s25 }
  0x15   :  { %s102_s26 = scalar_lea.vmem %s60_s25, 256  ;;  %p107_p9 = scmp.lt.s32.totalorder %s60_s25, %s60_s25 }
  0x16   :  { %37 = vadd.xlane.f32.xlu0 %v35_v2  ;;  %p103_p8 = scmp.ne.s32.totalorder %s60_s25, %s102_s26  ;;  %p108_p10 = scmp.lt.s32.totalorder %s102_s26, %s102_s26 }
  0x18   :  { %p109_p11 = por %p108_p10, %p107_p9 }
  0x1a   :  { %39 = vadd.xlane.f32.xlu0 %v36_v3  ;;  %p110_p12 = pnand %p109_p11, %p103_p8 }
  0xa3   :  { %v38_v4 = vpop.xlane.xlu0 %37 }
  0xa4   :  { %v42_v5 = vmul.f32 0.0078125, %v38_v4 }
  0xa6   :  { %v44_v6 = vadd.f32 1e-06, %v42_v5 }
  0xa7   :  { %v40_v7 = vpop.xlane.xlu0 %39 }
  0xa8   :  { %76 = vrsqrt.f32 %v44_v6  ;;  %v43_v8 = vmul.f32 0.0078125, %v40_v7 }
  0xaa   :  { %v45_v9 = vadd.f32 1e-06, %v43_v8 }
  0xac   :  { %78 = vrsqrt.f32 %v45_v9 }
  0xb2   :  { %v77_v10 = vpop.eup %76 }
  0xb3   :  { %v48_v12 = vmul.f32 %v77_v10, %v33_v0 }
  0xb5   :  { %v50_v13 = vmul.f32 %v71_v11, %v48_v12 }
  0xb6   :  { %v79_v14 = vpop.eup %78 }
  0xb7   :  { %v49_v15 = vmul.f32 %v79_v14, %v34_v1  ;;  %52 = vst [vmem:[#allocation5] sm:$0xff] %v50_v13 }
  0xb9   :  { %v51_v16 = vmul.f32 %v71_v11, %v49_v15 }
  0xbb   :  { %53 = vst [vmem:[#allocation5 + $0x8] sm:$0xff] %v51_v16 }
  0xbc   :  { %113 = shalt.err (!%p110_p12)
}
  0xbd   :  { %s114_s1 = scalar_lea.hbm %s182_s2, 256 }
  0xbe   :  { %p115_p13 = scmp.ne.s32.totalorder %s182_s2, %s114_s1  ;;  %p118_p0 = scmp.lt.u32.totalorder %s114_s1, %s182_s2 }
  0xc0   :  { %p120_p1 = pnand %p118_p0, %p115_p13 }
  0xc2   :  { %123 = shalt.err (!%p120_p1)
}
  0xc3   :  { %65 = dma.vmem_to_hbm [thread:$0]  %s60_s25, 256, %s182_s2, [#allocation4], %s129_s19, %s129_s19, %s130_s20  }
  0xc4   :  { %126 = dma.done.wait [#allocation4], 256  }
  0xc5   :  { %127 = vsyncadd [#allocation4], 4294967040 }
  0xc6   :  { %69 = vsyncpa [#allocation3], 1 }
  0xc7   :  { %70 = vsyncpa [#allocation4], 1 }

</bundles_post_ra>
